<compile_context>
chip_gen: v7x
topology: tpu7x:2x2x1
jax: 0.10.0
libtpu: 0.0.40
codegen_flags: <defaults>
</compile_context>

<pallas_src>
import functools

import jax
import jax.numpy as jnp
from jax.experimental import pallas as pl
from jax.experimental.pallas import tpu as pltpu

EPS = 1e-8


def _loss_kernel(pred_ref, mask_ref, out_ref, *, nc, tm, eps, mask_rows):
    """One (tm, H*W) row tile -> [bce_sum, dice_sum] packed in an (8,128) block."""
    x = pred_ref[...].astype(jnp.float32)
    y = mask_ref[...].astype(jnp.float32)

    if mask_rows:
        # Partial last tile: out-of-bounds rows may contain garbage; zero the
        # inputs *before* any transcendental so NaN/Inf cannot propagate.
        row = (jax.lax.broadcasted_iota(jnp.int32, (tm, 1), 0)
               + pl.program_id(0) * tm)
        valid = row < nc                                     # (tm, 1) bool
        x = jnp.where(valid, x, 0.0)
        y = jnp.where(valid, y, 0.0)
        valid_f = valid.astype(jnp.float32)

    # sigmoid via a single EUP tanh (no exp / log1p / divide / select):
    p = 0.5 * jnp.tanh(0.5 * x) + 0.5
    # Numerically stable BCE-with-logits:
    #   max(x,0) - x*y + log1p(exp(-|x|)) == max(x,0) - x*y - log(max(p, 1-p))
    bce = jnp.maximum(x, 0.0) - x * y - jnp.log(jnp.maximum(p, 1.0 - p))

    bce_rows = jnp.sum(bce, axis=1, keepdims=True)           # (tm, 1)
    inter = jnp.sum(p * y, axis=1, keepdims=True)            # (tm, 1)
    union = jnp.sum(p + y, axis=1, keepdims=True)            # (tm, 1)
    dice = 1.0 - (2.0 * inter + eps) / (union + eps)         # (tm, 1)

    if mask_rows:
        bce_rows = bce_rows * valid_f
        dice = dice * valid_f

    bce_part = jnp.sum(bce_rows)                             # scalar
    dice_part = jnp.sum(dice)                                # scalar

    # Pack both per-tile partials into one lane-dense (8,128) block: a single
    # vector store per tile instead of per-row masked stores.
    r = jax.lax.broadcasted_iota(jnp.int32, (8, 128), 0)
    l = jax.lax.broadcasted_iota(jnp.int32, (8, 128), 1)
    out_ref[...] = (jnp.where((r == 0) & (l == 0), bce_part, 0.0)
                    + jnp.where((r == 0) & (l == 1), dice_part, 0.0))


def _vmem_capacity_bytes():
    try:
        return int(pltpu.get_tpu_info().vmem_capacity_bytes)
    except Exception:
        return 64 * 1024 * 1024      # conservative (v7x-sized) default


def _tile_params(nc, hw, itemsize):
    """Row-tile size and VMEM limit, sized against the chip's VMEM capacity."""
    vmem_cap = _vmem_capacity_bytes()
    if vmem_cap <= 64 * 1024 * 1024:        # v7x-class: 64 MiB VMEM per core
        tile_budget = 4 * 1024 * 1024       # f32-equivalent bytes per input tile
        vmem_limit = 48 * 1024 * 1024
    else:                                    # v5e / v6e: 128 MiB VMEM
        tile_budget = 6 * 1024 * 1024
        vmem_limit = 96 * 1024 * 1024

    # Size the tile against the in-kernel f32 working set (casts/temporaries),
    # which dominates VMEM regardless of the (possibly bf16) DMA dtype.
    tm = tile_budget // max(1, hw * 4)
    sub = max(8, 32 // itemsize)            # sublane packing: f32=8, bf16=16, int8=32
    tm = max(sub, (tm // sub) * sub)
    nc_ceil = -(-nc // sub) * sub
    tm = min(tm, nc_ceil)
    # TODO(synk): for extremely large H*W (a single `sub`-row tile exceeding the
    # budget) add a second "arbitrary" grid axis over H*W with VMEM scratch
    # accumulators for bce/inter/union.
    return tm, vmem_limit


def loss_function(pred, mask, eps=EPS):
    """pred, mask: (N, C, H, W) arrays (any float dtype). Returns scalar f32 loss."""
    n, c, h, w = pred.shape
    nc, hw = n * c, h * w

    # Keep inputs in their native dtype (bf16 halves HBM traffic); cast in-kernel.
    pred2d = pred.reshape(nc, hw)
    mask2d = mask.reshape(nc, hw)

    itemsize = max(jnp.dtype(pred2d.dtype).itemsize,
                   jnp.dtype(mask2d.dtype).itemsize)
    tm, vmem_limit = _tile_params(nc, hw, itemsize)
    num_tiles = -(-nc // tm)
    mask_rows = (nc % tm) != 0              # only a partial last tile pays for masking

    kernel = functools.partial(_loss_kernel, nc=nc, tm=tm, eps=float(eps),
                               mask_rows=mask_rows)

    in_bytes = (pred2d.size * pred2d.dtype.itemsize
                + mask2d.size * mask2d.dtype.itemsize)
    cost = pl.CostEstimate(
        flops=12 * nc * hw,
        transcendentals=2 * nc * hw,        # tanh + log per element
        bytes_accessed=in_bytes + num_tiles * 8 * 128 * 4,
    )

    partials = pl.pallas_call(
        kernel,
        out_shape=jax.ShapeDtypeStruct((num_tiles * 8, 128), jnp.float32),
        grid_spec=pltpu.PrefetchScalarGridSpec(
            num_scalar_prefetch=0,
            grid=(num_tiles,),
            in_specs=[
                pl.BlockSpec((tm, hw), lambda i: (i, 0)),
                pl.BlockSpec((tm, hw), lambda i: (i, 0)),
            ],
            out_specs=pl.BlockSpec((8, 128), lambda i: (i, 0)),
        ),
        compiler_params=pltpu.CompilerParams(
            dimension_semantics=("parallel",),   # independent tiles -> megacore
            vmem_limit_bytes=vmem_limit,
        ),
        cost_estimate=cost,
    )(pred2d, mask2d)

    # Tiny epilogue: column 0 holds per-tile BCE sums, column 1 per-tile dice sums.
    bce_mean = jnp.sum(partials[:, 0]) / jnp.float32(nc * hw)
    dice_mean = jnp.sum(partials[:, 1]) / jnp.float32(nc)
    return dice_mean + bce_mean


def _reference(pred, mask, eps=EPS):
    x = pred.astype(jnp.float32)
    y = mask.astype(jnp.float32)
    bce = jnp.maximum(x, 0.0) - x * y + jnp.log1p(jnp.exp(-jnp.abs(x)))
    bce_mean = jnp.mean(bce)
    p = jax.nn.sigmoid(x)
    inter = jnp.sum(p * y, axis=(2, 3))
    union = jnp.sum(p + y, axis=(2, 3))
    dice = 1.0 - (2.0 * inter + eps) / (union + eps)
    return jnp.mean(dice) + bce_mean


if __name__ == "__main__":
    key = jax.random.PRNGKey(0)
    k1, k2 = jax.random.split(key)
    N, C, H, W = 2, 4, 16, 16
    pred = jax.random.normal(k1, (N, C, H, W), dtype=jnp.float32)
    mask = (jax.random.uniform(k2, (N, C, H, W)) > 0.5).astype(jnp.float32)

    loss = loss_function(pred, mask)
    jax.block_until_ready(loss)

    ref = _reference(pred, mask)
    assert jnp.allclose(loss, ref, rtol=1e-5, atol=1e-6), (loss, ref)

    print("KERNEL_OK")
</pallas_src>

<mosaic_0001>
module attributes {stable_mosaic.version = 11 : i64} {
  func.func @_loss_kernel(%arg0: i32, %arg1: memref<8x256xf32, #tpu.memory_space<vmem>>, %arg2: memref<8x256xf32, #tpu.memory_space<vmem>>, %arg3: memref<8x128xf32, #tpu.memory_space<vmem>>) attributes {dimension_semantics = [#tpu.dimension_semantics<parallel>], iteration_bounds = array<i64: 1>, scalar_prefetch = 0 : i64, scratch_operands = 0 : i64, tpu.core_type = #tpu.core_type<tc>, window_params = [{transform_indices = @transform_0, window_bounds = array<i64: 8, 256>}, {transform_indices = @transform_1, window_bounds = array<i64: 8, 256>}, {transform_indices = @transform_2, window_bounds = array<i64: 8, 128>}]} {
    %c0 = arith.constant 0 : index
    %c0_0 = arith.constant 0 : index
    %0 = vector.load %arg1[%c0, %c0_0] : memref<8x256xf32, #tpu.memory_space<vmem>>, vector<8x256xf32>
    %c0_1 = arith.constant 0 : index
    %c0_2 = arith.constant 0 : index
    %1 = vector.load %arg2[%c0_1, %c0_2] : memref<8x256xf32, #tpu.memory_space<vmem>>, vector<8x256xf32>
    %cst = arith.constant 5.000000e-01 : f32
    %2 = vector.broadcast %cst : f32 to vector<8x256xf32>
    %3 = arith.mulf %2, %0 : vector<8x256xf32>
    %4 = math.tanh %3 : vector<8x256xf32>
    %cst_3 = arith.constant 5.000000e-01 : f32
    %5 = vector.broadcast %cst_3 : f32 to vector<8x256xf32>
    %6 = arith.mulf %5, %4 : vector<8x256xf32>
    %cst_4 = arith.constant 5.000000e-01 : f32
    %7 = vector.broadcast %cst_4 : f32 to vector<8x256xf32>
    %8 = arith.addf %6, %7 : vector<8x256xf32>
    %cst_5 = arith.constant 0.000000e+00 : f32
    %9 = vector.broadcast %cst_5 : f32 to vector<8x256xf32>
    %10 = arith.maximumf %0, %9 : vector<8x256xf32>
    %11 = arith.mulf %0, %1 : vector<8x256xf32>
    %12 = arith.subf %10, %11 : vector<8x256xf32>
    %cst_6 = arith.constant 1.000000e+00 : f32
    %13 = vector.broadcast %cst_6 : f32 to vector<8x256xf32>
    %14 = arith.subf %13, %8 : vector<8x256xf32>
    %15 = arith.maximumf %8, %14 : vector<8x256xf32>
    %16 = math.log %15 : vector<8x256xf32>
    %17 = arith.subf %12, %16 : vector<8x256xf32>
    %cst_7 = arith.constant dense<0.000000e+00> : vector<8xf32>
    %18 = vector.multi_reduction <add>, %17, %cst_7 [1] : vector<8x256xf32> to vector<8xf32>
    %19 = vector.shape_cast %18 : vector<8xf32> to vector<8x1xf32>
    %20 = arith.mulf %8, %1 : vector<8x256xf32>
    %cst_8 = arith.constant dense<0.000000e+00> : vector<8xf32>
    %21 = vector.multi_reduction <add>, %20, %cst_8 [1] : vector<8x256xf32> to vector<8xf32>
    %22 = vector.shape_cast %21 : vector<8xf32> to vector<8x1xf32>
    %23 = arith.addf %8, %1 : vector<8x256xf32>
    %cst_9 = arith.constant dense<0.000000e+00> : vector<8xf32>
    %24 = vector.multi_reduction <add>, %23, %cst_9 [1] : vector<8x256xf32> to vector<8xf32>
    %25 = vector.shape_cast %24 : vector<8xf32> to vector<8x1xf32>
    %cst_10 = arith.constant 2.000000e+00 : f32
    %26 = vector.broadcast %cst_10 : f32 to vector<8x1xf32>
    %27 = arith.mulf %26, %22 : vector<8x1xf32>
    %cst_11 = arith.constant 9.99999993E-9 : f32
    %28 = vector.broadcast %cst_11 : f32 to vector<8x1xf32>
    %29 = arith.addf %27, %28 : vector<8x1xf32>
    %cst_12 = arith.constant 9.99999993E-9 : f32
    %30 = vector.broadcast %cst_12 : f32 to vector<8x1xf32>
    %31 = arith.addf %25, %30 : vector<8x1xf32>
    %32 = arith.divf %29, %31 : vector<8x1xf32>
    %cst_13 = arith.constant 1.000000e+00 : f32
    %33 = vector.broadcast %cst_13 : f32 to vector<8x1xf32>
    %34 = arith.subf %33, %32 : vector<8x1xf32>
    %35 = vector.shape_cast %19 : vector<8x1xf32> to vector<1x8x1xf32>
    %cst_14 = arith.constant dense<0.000000e+00> : vector<1xf32>
    %36 = vector.multi_reduction <add>, %35, %cst_14 [1, 2] : vector<1x8x1xf32> to vector<1xf32>
    %37 = vector.shape_cast %36 : vector<1xf32> to vector<1x1x1xf32>
    %38 = vector.extract %37[0, 0, 0] : f32 from vector<1x1x1xf32>
    %39 = vector.shape_cast %34 : vector<8x1xf32> to vector<1x8x1xf32>
    %cst_15 = arith.constant dense<0.000000e+00> : vector<1xf32>
    %40 = vector.multi_reduction <add>, %39, %cst_15 [1, 2] : vector<1x8x1xf32> to vector<1xf32>
    %41 = vector.shape_cast %40 : vector<1xf32> to vector<1x1x1xf32>
    %42 = vector.extract %41[0, 0, 0] : f32 from vector<1x1x1xf32>
    %43 = tpu.iota {dimensions = array<i32: 0>} : vector<8x128xi32>
    %44 = tpu.iota {dimensions = array<i32: 1>} : vector<8x128xi32>
    %c0_i32 = arith.constant 0 : i32
    %45 = vector.broadcast %c0_i32 : i32 to vector<8x128xi32>
    %46 = arith.cmpi eq, %43, %45 : vector<8x128xi32>
    %c0_i32_16 = arith.constant 0 : i32
    %47 = vector.broadcast %c0_i32_16 : i32 to vector<8x128xi32>
    %48 = arith.cmpi eq, %44, %47 : vector<8x128xi32>
    %49 = arith.andi %46, %48 : vector<8x128xi1>
    %cst_17 = arith.constant 0.000000e+00 : f32
    %50 = vector.broadcast %38 : f32 to vector<8x128xf32>
    %51 = vector.broadcast %cst_17 : f32 to vector<8x128xf32>
    %52 = arith.select %49, %50, %51 : vector<8x128xi1>, vector<8x128xf32>
    %c0_i32_18 = arith.constant 0 : i32
    %53 = vector.broadcast %c0_i32_18 : i32 to vector<8x128xi32>
    %54 = arith.cmpi eq, %43, %53 : vector<8x128xi32>
    %c1_i32 = arith.constant 1 : i32
    %55 = vector.broadcast %c1_i32 : i32 to vector<8x128xi32>
    %56 = arith.cmpi eq, %44, %55 : vector<8x128xi32>
    %57 = arith.andi %54, %56 : vector<8x128xi1>
    %cst_19 = arith.constant 0.000000e+00 : f32
    %58 = vector.broadcast %42 : f32 to vector<8x128xf32>
    %59 = vector.broadcast %cst_19 : f32 to vector<8x128xf32>
    %60 = arith.select %57, %58, %59 : vector<8x128xi1>, vector<8x128xf32>
    %61 = arith.addf %52, %60 : vector<8x128xf32>
    %c0_20 = arith.constant 0 : index
    %c0_21 = arith.constant 0 : index
    %62 = vector.load %arg3[%c0_20, %c0_21] : memref<8x128xf32, #tpu.memory_space<vmem>>, vector<8x128xf32>
    tpu.vector_store %arg3[%c0_20, %c0_21], %61 {strides = array<i32>} : memref<8x128xf32, #tpu.memory_space<vmem>>, vector<8x128xf32>,
    return
  }
  func.func @transform_0(%arg0: i32) -> (i32, i32) {
    %c0_i32 = arith.constant 0 : i32
    %c0_i32_0 = arith.constant 0 : i32
    return %arg0, %c0_i32 : i32, i32
  }
  func.func @transform_1(%arg0: i32) -> (i32, i32) {
    %c0_i32 = arith.constant 0 : i32
    %c0_i32_0 = arith.constant 0 : i32
    return %arg0, %c0_i32 : i32, i32
  }
  func.func @transform_2(%arg0: i32) -> (i32, i32) {
    %c0_i32 = arith.constant 0 : i32
    %c0_i32_0 = arith.constant 0 : i32
    return %arg0, %c0_i32 : i32, i32
  }
}

</mosaic_0001>

<bundles_post_ra>
// kernel: tpu_custom_call.1
= control target key start
LH: loop header
LB: loop body
LE: loop exit
PB: predicated region body
PF: predicated region fallthrough
CT: control target
= control target key end

     0   :  { %7 = vsyncpa [#allocation3], 0  ;;  %s278_s0 = inlined_call_operand.hbm [shape: f32[8,256], index: 0, kind: input, shape index: {}]   ;;  %s279_s1 = inlined_call_operand.hbm [shape: f32[8,256], index: 1, kind: input, shape index: {}]   ;;  %s280_s2 = inlined_call_operand.hbm [shape: f32[8,128], index: 2, kind: output, shape index: {}]  }
   0x1   :  { %8 = vsyncpa [#allocation6], 0 }
   0x2   :  { %9 = vsyncpa [#allocation4], 0  ;;  %s224_s9 = smov [#allocation2]   ;;  %s225_s11 = smov [#allocation5]  }
   0x3   :  { %s16_s10 = sshll.u32 %s224_s9, 4  ;;  %s26_s12 = sshll.u32 %s225_s11, 4  ;;  %s17_s10 = int_to_ptr.vmem [resolvable:$true] %s16_s10  ;;  %s27_s12 = int_to_ptr.vmem [resolvable:$true] %s26_s12 }
   0x4   :  { %s152_s15 = scalar_lea.hbm %s278_s0, 256 }
   0x5   :  { %p153_p0 = scmp.ne.s32.totalorder %s278_s0, %s152_s15  ;;  %p156_p1 = scmp.lt.u32.totalorder %s152_s15, %s278_s0 }
   0x7   :  { %p158_p2 = pnand %p156_p1, %p153_p0 }
   0x9   :  { %161 = shalt.err (!%p158_p2)
}
   0xa   :  { %s162_s20 = scalar_lea.vmem %s17_s10, 256  ;;  %p167_p4 = scmp.lt.s32.totalorder %s17_s10, %s17_s10 }
   0xb   :  { %p163_p3 = scmp.ne.s32.totalorder %s17_s10, %s162_s20  ;;  %p168_p5 = scmp.lt.s32.totalorder %s162_s20, %s162_s20 }
   0xd   :  { %p169_p6 = por %p168_p5, %p167_p4 }
   0xf   :  { %p170_p7 = pnand %p169_p6, %p163_p3 }
  0x11   :  { %173 = shalt.err (!%p170_p7)
}
  0x12   :  { %19 = dma.hbm_to_vmem [thread:$0]  %s278_s0, 256, %s17_s10, [#allocation3]  }
  0x13   :  { %s174_s25 = scalar_lea.hbm %s279_s1, 256 }
  0x14   :  { %p175_p8 = scmp.ne.s32.totalorder %s279_s1, %s174_s25  ;;  %p178_p9 = scmp.lt.u32.totalorder %s174_s25, %s279_s1 }
  0x16   :  { %p180_p10 = pnand %p178_p9, %p175_p8 }
  0x18   :  { %183 = shalt.err (!%p180_p10)
}
  0x19   :  { %s184_s30 = scalar_lea.vmem %s27_s12, 256  ;;  %p189_p12 = scmp.lt.s32.totalorder %s27_s12, %s27_s12 }
  0x1a   :  { %p185_p11 = scmp.ne.s32.totalorder %s27_s12, %s184_s30  ;;  %p190_p13 = scmp.lt.s32.totalorder %s184_s30, %s184_s30 }
  0x1c   :  { %p191_p0 = por %p190_p13, %p189_p12 }
  0x1e   :  { %p192_p1 = pnand %p191_p0, %p185_p11 }
  0x20   :  { %195 = shalt.err (!%p192_p1)
}
  0x21   :  { %29 = dma.hbm_to_vmem [thread:$0]  %s279_s1, 256, %s27_s12, [#allocation6]  }
  0x22   :  { %218 = dma.done.wait [#allocation3], 256  }
  0x23   :  { %219 = vsyncadd [#allocation3], 4294967040 }
  0x24   :  { %220 = dma.done.wait [#allocation6], 256  }
  0x25   :  { %221 = vsyncadd [#allocation6], 4294967040  ;;  %v36_v0 = vld [vmem:[#allocation2] sm:$0xff]  ;;  %v37_v1 = vld [vmem:[#allocation2 + $0x8] sm:$0xff]  ;;  %vm83_vm0 = vcmask 7168   ;;  %v104_v60 = vlaneseq  ;;  %s226_s5 = smov [#allocation7]  }
  0x26   :  { %v40_v2 = vmul.f32 0.5, %v36_v0  ;;  %v41_v3 = vmul.f32 0.5, %v37_v1  ;;  %v38_v7 = vld [vmem:[#allocation5] sm:$0xff]  ;;  %v39_v9 = vld [vmem:[#allocation5 + $0x8] sm:$0xff]  ;;  %v48_v22 = vmax.f32 %v36_v0, 0.0  ;;  %v49_v24 = vmax.f32 %v37_v1, 0.0 }
  0x27   :  { %v50_v23 = vmul.f32 %v38_v7, %v36_v0  ;;  %v51_v25 = vmul.f32 %v39_v9, %v37_v1  ;;  %v105_v61 = vshrl.u32 %v104_v60, 7  ;;  %v107_v62 = vand.u32 127, %v104_v60  ;;  %s125_s6 = sshll.u32 %s226_s5, 4  ;;  %s126_s6 = int_to_ptr.vmem [resolvable:$true] %s125_s6 }
  0x28   :  { %142 = vtanh.f32 %v40_v2  ;;  %s196_s7 = scalar_lea.vmem %s126_s6, 128  ;;  %p201_p3 = scmp.lt.s32.totalorder %s126_s6, %s126_s6 }
  0x29   :  { %144 = vtanh.f32 %v41_v3  ;;  %v52_v26 = vsub.f32 %v48_v22, %v50_v23  ;;  %v53_v28 = vsub.f32 %v49_v24, %v51_v25  ;;  %vm108_vm1 = vcmp.eq.s32.totalorder %v105_v61, 0  ;;  %p197_p2 = scmp.ne.s32.totalorder %s126_s6, %s196_s7  ;;  %p202_p4 = scmp.lt.s32.totalorder %s196_s7, %s196_s7 }
  0x2a   :  { %vm109_vm2 = vcmp.eq.s32.totalorder %v107_v62, 0  ;;  %vm113_vm3 = vcmp.eq.s32.totalorder %v107_v62, 1 }
  0x2b   :  { %vm110_vm4 = vmand %vm108_vm1, %vm109_vm2  ;;  %p203_p5 = por %p202_p4, %p201_p3 }
  0x2c   :  { %vm114_vm5 = vmand %vm108_vm1, %vm113_vm3 }
  0x2d   :  { %p204_p6 = pnand %p203_p5, %p197_p2 }
  0x32   :  { %v143_v4 = vpop.eup %142 }
  0x33   :  { %v145_v5 = vpop.eup %144  ;;  %v44_v6 = vmul.f32 0.5, %v143_v4 }
  0x34   :  { %v45_v8 = vmul.f32 0.5, %v145_v5 }
  0x35   :  { %v46_v10 = vadd.f32 0.5, %v44_v6 }
  0x36   :  { %v47_v11 = vadd.f32 0.5, %v45_v8 }
  0x37   :  { %v72_v12 = vadd.f32 %v46_v10, %v38_v7  ;;  %v54_v13 = vsub.f32 1.0, %v46_v10  ;;  %v67_v15 = vmul.f32 %v46_v10, %v38_v7 }
  0x38   :  { %v73_v14 = vadd.f32 %v47_v11, %v39_v9  ;;  %v68_v16 = vmul.f32 %v47_v11, %v39_v9  ;;  %v55_v17 = vsub.f32 1.0, %v47_v11 }
  0x39   :  { %v56_v18 = vmax.f32 %v46_v10, %v54_v13 }
  0x3a   :  { %v74_v19 = vadd.f32 %v73_v14, %v72_v12  ;;  %v57_v20 = vmax.f32 %v47_v11, %v55_v17  ;;  %v69_v21 = vadd.f32 %v68_v16, %v67_v15 }
  0x3b   :  { %146 = vlog2.f32 %v56_v18 }
  0x3c   :  { %75 = vadd.xlane.f32.xlu0 %v74_v19  ;;  %148 = vlog2.f32 %v57_v20 }
  0x40   :  { %70 = vadd.xlane.f32.xlu0 %v69_v21 }
  0x45   :  { %v147_v27 = vpop.eup %146 }
  0x46   :  { %v149_v29 = vpop.eup %148  ;;  %v59_v30 = vmul.f32 0.6931472, %v147_v27 }
  0x47   :  { %v61_v31 = vmul.f32 0.6931472, %v149_v29 }
  0x48   :  { %v62_v32 = vsub.f32 %v52_v26, %v59_v30 }
  0x49   :  { %v63_v33 = vsub.f32 %v53_v28, %v61_v31 }
  0x4b   :  { %v64_v34 = vadd.f32 %v63_v33, %v62_v32 }
  0x4d   :  { %65 = vadd.xlane.f32.xlu1 %v64_v34 }
  0xc9   :  { %v76_v35 = vpop.xlane.xlu0 %75 }
  0xca   :  { %v79_v36 = vadd.f32 1e-08, %v76_v35 }
  0xcc   :  { %150 = vrcp.f32 %v79_v36 }
  0xcd   :  { %v71_v37 = vpop.xlane.xlu0 %70 }
  0xce   :  { %v77_v38 = vmul.f32 2.0, %v71_v37 }
  0xd0   :  { %v78_v39 = vadd.f32 1e-08, %v77_v38 }
  0xd6   :  { %v151_v40 = vpop.eup %150 }
  0xd7   :  { %v81_v41 = vmul.f32 %v151_v40, %v78_v39 }
  0xd9   :  { %v82_v42 = vsub.f32 1.0, %v81_v41 }
  0xda   :  { %v66_v43 = vpop.xlane.xlu1 %65 }
  0xdb   :  { %v94_v44 = vsel %vm83_vm0, %v82_v42, 0.0  ;;  %v84_v45 = vsel %vm83_vm0, %v66_v43, 0.0 }
  0xdc   :  { %95 = vadd.xlane.f32.xlu0 %v94_v44  ;;  %85 = vadd.xlane.f32.xlu1 %v84_v45 }
 0x169   :  { %v96_v46 = vpop.xlane.xlu0 %95  ;;  %v86_v47 = vpop.xlane.xlu1 %85 }
 0x16a   :  { %v97_v48 = vrot.slane %v96_v46, 4  ;;  %v87_v49 = vrot.slane %v86_v47, 4 }
 0x16c   :  { %v98_v50 = vadd.f32 %v97_v48, %v96_v46  ;;  %v88_v51 = vadd.f32 %v87_v49, %v86_v47 }
 0x16e   :  { %v99_v52 = vrot.slane %v98_v50, 2  ;;  %v89_v53 = vrot.slane %v88_v51, 2 }
 0x170   :  { %v100_v54 = vadd.f32 %v99_v52, %v98_v50  ;;  %v90_v55 = vadd.f32 %v89_v53, %v88_v51 }
 0x172   :  { %v91_v56 = vrot.slane %v90_v55, 1  ;;  %v101_v57 = vrot.slane %v100_v54, 1 }
 0x174   :  { %v92_v58 = vadd.f32 %v91_v56, %v90_v55  ;;  %v102_v59 = vadd.f32 %v101_v57, %v100_v54 }
 0x176   :  { %135 = vpush %v92_v58 }
 0x177   :  { %137 = vpush %v102_v59 }
 0x1a7   :  { %s136_s1 = spop %135 }
 0x1a8   :  { %v111_v63 = vstv %s136_s1  ;;  %s138_s4 = spop %137 }
 0x1a9   :  { %v112_v0 = vsel %vm110_vm4, %v111_v63, 0.0  ;;  %v115_v1 = vstv %s138_s4 }
 0x1aa   :  { %v116_v2 = vsel %vm114_vm5, %v115_v1, 0.0 }
 0x1ab   :  { %v117_v3 = vadd.f32 %v116_v2, %v112_v0 }
 0x1ad   :  { %118 = vst [vmem:[#allocation7] sm:$0xff] %v117_v3 }
 0x1ae   :  { %207 = shalt.err (!%p204_p6)
}
 0x1af   :  { %s208_s10 = scalar_lea.hbm %s280_s2, 128 }
 0x1b0   :  { %p209_p7 = scmp.ne.s32.totalorder %s280_s2, %s208_s10  ;;  %p212_p8 = scmp.lt.u32.totalorder %s208_s10, %s280_s2 }
 0x1b2   :  { %p214_p9 = pnand %p212_p8, %p209_p7 }
 0x1b4   :  { %217 = shalt.err (!%p214_p9)
}
 0x1b5   :  { %128 = dma.vmem_to_hbm [thread:$0]  %s126_s6, 128, %s280_s2, [#allocation4]  }
 0x1b6   :  { %222 = dma.done.wait [#allocation4], 128  }
 0x1b7   :  { %223 = vsyncadd [#allocation4], 4294967168 }
 0x1b8   :  { %132 = vsyncpa [#allocation3], 1 }
 0x1b9   :  { %133 = vsyncpa [#allocation6], 1 }
 0x1ba   :  { %134 = vsyncpa [#allocation4], 1 }

</bundles_post_ra>
